<compile_context>
chip_gen: v6e
topology: v6e:2x2x1
jax: 0.10.0
libtpu: 0.0.40
codegen_flags: <defaults>
</compile_context>

<pallas_src>
import functools

import numpy as np
import jax
import jax.numpy as jnp
from jax import lax
from jax.experimental import pallas as pl
from jax.experimental.pallas import tpu as pltpu

NUM_QUBITS = 4
NUM_LAYERS = 2
DIM = 2 ** NUM_QUBITS
BATCH = 512          # batched so the lane axis is lane-dense (>= 128)
_LANE = 128


# ----------------------------- gate matrices (Qiskit conventions) ----------
def _rx(theta):
    c, s = np.cos(theta / 2.0), np.sin(theta / 2.0)
    return np.array([[c, -1j * s], [-1j * s, c]], dtype=np.complex128)


def _ry(theta):
    c, s = np.cos(theta / 2.0), np.sin(theta / 2.0)
    return np.array([[c, -s], [s, c]], dtype=np.complex128)


def _rz(theta):
    return np.array([[np.exp(-1j * theta / 2.0), 0.0],
                     [0.0, np.exp(1j * theta / 2.0)]], dtype=np.complex128)


def _embed_1q(gate, q, n=NUM_QUBITS):
    # qubit 0 = LSB  =>  full = I_{2^(n-1-q)} (x) G (x) I_{2^q}
    return np.kron(np.eye(2 ** (n - 1 - q)), np.kron(gate, np.eye(2 ** q)))


def _cnot(control, target, n=NUM_QUBITS):
    dim = 2 ** n
    U = np.zeros((dim, dim), dtype=np.complex128)
    for k in range(dim):
        j = k ^ (1 << target) if (k >> control) & 1 else k
        U[j, k] = 1.0
    return U


def build_variational_unitary(weights, n=NUM_QUBITS, num_layers=NUM_LAYERS):
    """Lockwood layers: CNOT(i, i-1) chain, then RX/RY/RZ per qubit.

    Parameter indexing reproduces the original module exactly
    (params[2i], params[2i+1], params[2i+2] for qubit i within a layer slice).
    """
    W = np.eye(2 ** n, dtype=np.complex128)
    for layer in range(num_layers):
        lp = weights[layer * n * 3:(layer + 1) * n * 3]
        for i in range(1, n):
            W = _cnot(i, i - 1, n) @ W
        for i in range(n):
            W = _embed_1q(_rx(lp[i * 2]), i, n) @ W
            W = _embed_1q(_ry(lp[i * 2 + 1]), i, n) @ W
            W = _embed_1q(_rz(lp[i * 2 + 2]), i, n) @ W
    return W


def observable_matrix(n=NUM_QUBITS):
    """Columns of +/-1 eigenvalues for 'ZZII' and 'IIZZ' (Qiskit label order)."""
    # TODO(synk): Decode_Layer source not shown; decoded as the Z-parity
    # expectation values the module's 'ZZII'/'IIZZ' readout implies.
    dim = 2 ** n
    idx = np.arange(dim)
    zz_hi = 1.0 - 2.0 * (((idx >> (n - 1)) & 1) ^ ((idx >> (n - 2)) & 1))  # ZZII
    zz_lo = 1.0 - 2.0 * (((idx >> 1) & 1) ^ (idx & 1))                      # IIZZ
    return np.stack([zz_hi, zz_lo], axis=1).astype(np.float64)              # (dim, 2)


# ----------------------------- chip-aware tiling ----------------------------
def _num_parallel_cores():
    """TensorCores addressable via a 'parallel' grid axis on one chip."""
    # (pltpu.get_tpu_info() could also be consulted; device_kind is sufficient
    #  and always available, and a wrong guess only affects performance.)
    try:
        kind = jax.devices()[0].device_kind.lower()
    except Exception:  # pragma: no cover - defensive
        return 1
    if "v7" in kind or "7x" in kind:          # v7x: 2 TensorCores per chip
        return 2
    if any(t in kind for t in ("v3", "v4", "v5p")):   # megacore chips
        return 2
    return 1                                   # v5e / v6e: single TensorCore


def _pick_b_tile(batch):
    cores = _num_parallel_cores()
    n_tiles = max(1, min(cores, -(-batch // _LANE)))          # >=128 lanes per tile
    padded = -(-batch // (n_tiles * _LANE)) * (n_tiles * _LANE)
    return padded // n_tiles


# ----------------------------- Pallas kernel --------------------------------
def vqc_kernel(trig_ref, wb_ref, out_ref, psi_ref):
    n, dim = NUM_QUBITS, DIM
    trig = trig_ref[...]                       # (2n, b): rows [0:n]=cos(x_q), [n:2n]=sin(x_q)
    b = trig.shape[1]
    half_cos = 0.5 * trig[:n, :]               # cos(x)/2 per qubit          (n, b)
    neg_half_sin = -0.5 * trig[n:, :]          # -sin(x)/2 per qubit (imag)  (n, b)

    # Batch-invariant bit signs built once at lane-width 1 (off the wide VALU path).
    k = lax.broadcasted_iota(jnp.int32, (dim, 1), 0)            # basis index per sublane

    def qubit_real(q):
        # RX(x)RZ(x)|0>: real amp = cos^2(x/2) for bit 0, sin^2(x/2) for bit 1
        #              = 0.5 +/- cos(x)/2
        sgn = (1 - 2 * ((k >> q) & 1)).astype(jnp.float32)      # (dim, 1)
        return 0.5 + sgn * half_cos[q:q + 1, :]                 # (dim, b)

    # Product state psi[k] = prod_q amp_q(bit_q(k)); imag part is bit-independent.
    pr = qubit_real(0)                                          # (dim, b)
    pi = jnp.broadcast_to(neg_half_sin[0:1, :], (dim, b))       # (dim, b)
    for q in range(1, n):                                       # static unroll
        rq = qubit_real(q)
        cq = neg_half_sin[q:q + 1, :]
        pr, pi = pr * rq - pi * cq, pr * cq + pi * rq

    # Stacked [re; im] via aligned sliced stores (no sublane concatenate).
    psi_ref[0:dim, :] = pr
    psi_ref[dim:, :] = pi

    # Variational unitary as ONE real block matmul on the MXU:
    #   [[Re, -Im], [Im, Re]] @ [re; im] = [re(W psi); im(W psi)]
    y = jnp.dot(wb_ref[...], psi_ref[...], preferred_element_type=jnp.float32)  # (2*dim, b)
    y2 = y * y     # rows j and j+dim sum to |amp_j|^2 under the sign matmul below
    # TODO(synk): shots=1024 multinomial sampling noise of CircuitQNN not modeled.

    # Readout <ZZII>, <IIZZ>: +/-1 sign matrix (8 x 2*dim, rows >=2 unused padding)
    # built from tiny iotas, applied as one matmul on the otherwise-idle MXU
    # instead of two XLU sublane reductions.
    col = lax.broadcasted_iota(jnp.int32, (8, 2 * dim), 1) & (dim - 1)   # basis idx per column
    row = lax.broadcasted_iota(jnp.int32, (8, 2 * dim), 0)
    par_hi = ((col >> (n - 1)) ^ (col >> (n - 2))) & 1                   # ZZII parity
    par_lo = ((col >> 1) ^ col) & 1                                      # IIZZ parity
    sgn = (1 - 2 * jnp.where(row == 0, par_hi, par_lo)).astype(jnp.float32)  # (8, 2*dim)
    res = jnp.dot(sgn, y2, preferred_element_type=jnp.float32)           # (8, b)
    out_ref[...] = res[0:2, :]                                           # lane-dense (2, b) store


@functools.partial(jax.jit, static_argnames=("b_tile",))
def _vqc_forward_impl(x, w_block, *, b_tile):
    B = x.shape[0]
    grid = -(-B // b_tile)
    bp = grid * b_tile
    xt = x.astype(jnp.float32).T                                    # (n, B)
    # TODO(synk): cos/sin kept as a tiny fused XLA op around the kernel (in-kernel
    # EUP sin/cos not relied upon pending Mosaic transcendental support).  The
    # transpose / concat / pad / final transpose all fuse under this single jit,
    # so the whole forward is one dispatch.
    trig = jnp.concatenate([jnp.cos(xt), jnp.sin(xt)], axis=0)      # (2n, B)
    if bp != B:
        trig = jnp.pad(trig, ((0, 0), (0, bp - B)))

    out = pl.pallas_call(
        vqc_kernel,
        out_shape=jax.ShapeDtypeStruct((2, bp), jnp.float32),
        grid=(grid,),
        in_specs=[
            pl.BlockSpec((2 * NUM_QUBITS, b_tile), lambda i: (0, i)),   # per-tile trig block
            pl.BlockSpec((2 * DIM, 2 * DIM), lambda i: (0, 0)),         # resident 32x32 weights
        ],
        out_specs=pl.BlockSpec((2, b_tile), lambda i: (0, i)),
        scratch_shapes=[pltpu.VMEM((2 * DIM, b_tile), jnp.float32)],    # stacked [re; im]
        compiler_params=pltpu.CompilerParams(
            dimension_semantics=("parallel",)),                         # megacore / 2-TC sharding
    )(trig, w_block)                                                    # (2, bp)
    return out[:, :B].T                                                 # (B, 2) module convention


def vqc_forward(x, w_block):
    """x: (B, num_qubits) rotation angles -> (B, 2) [<ZZII>, <IIZZ>]."""
    return _vqc_forward_impl(x, w_block, b_tile=_pick_b_tile(x.shape[0]))


# ----------------------------- numpy reference (sanity) --------------------
def reference_forward(x_np, W, obs, n=NUM_QUBITS):
    outs = []
    for b in range(x_np.shape[0]):
        psi = np.zeros(2 ** n, dtype=np.complex128)
        psi[0] = 1.0
        for q in range(n):
            psi = _embed_1q(_rx(x_np[b, q]), q, n) @ psi
            psi = _embed_1q(_rz(x_np[b, q]), q, n) @ psi
        psi = W @ psi
        probs = np.abs(psi) ** 2
        outs.append(probs @ obs)
    return np.stack(outs)


if __name__ == "__main__":
    key = jax.random.PRNGKey(0)
    x = jax.random.uniform(key, (BATCH, NUM_QUBITS), minval=0.0, maxval=float(np.pi),
                           dtype=jnp.float32)

    # TorchConnector initial_weights are zeros.  (The original module passes
    # num_qubits*num_layers*2 zeros, under-counting the 3-rotation lockwood layer;
    # we use the correct lockwood count — still all zeros, numerically identical.)
    weights = np.zeros(NUM_QUBITS * NUM_LAYERS * 3, dtype=np.float64)

    W = build_variational_unitary(weights)                    # (dim, dim) complex
    # real block embedding of W: [[Re, -Im], [Im, Re]]  -> one fused MXU matmul
    w_block = jnp.asarray(np.block([[W.real, -W.imag],
                                    [W.imag, W.real]]), dtype=jnp.float32)

    out = vqc_forward(x, w_block)
    out = jax.block_until_ready(out)

    obs = observable_matrix()
    ref = reference_forward(np.asarray(x, dtype=np.float64), W, obs)
    assert out.shape == (BATCH, 2)
    assert np.allclose(np.asarray(out), ref, atol=1e-4), "kernel vs reference mismatch"

    print("KERNEL_OK")
</pallas_src>

<mosaic_0001>
module attributes {stable_mosaic.version = 11 : i64} {
  func.func @vqc_kernel(%arg0: i32, %arg1: memref<8x512xf32, #tpu.memory_space<vmem>>, %arg2: memref<32x32xf32, #tpu.memory_space<vmem>>, %arg3: memref<2x512xf32, #tpu.memory_space<vmem>>, %arg4: memref<32x512xf32, #tpu.memory_space<vmem>>) attributes {dimension_semantics = [#tpu.dimension_semantics<parallel>], iteration_bounds = array<i64: 1>, scalar_prefetch = 0 : i64, scratch_operands = 1 : i64, tpu.core_type = #tpu.core_type<tc>, window_params = [{transform_indices = @transform_0, window_bounds = array<i64: 8, 512>}, {pipeline_mode = #tpu.pipeline_mode<synchronous>, transform_indices = @transform_1, window_bounds = array<i64: 32, 32>}, {transform_indices = @transform_2, window_bounds = array<i64: 2, 512>}]} {
    %c0 = arith.constant 0 : index
    %c0_0 = arith.constant 0 : index
    %0 = vector.load %arg1[%c0, %c0_0] : memref<8x512xf32, #tpu.memory_space<vmem>>, vector<8x512xf32>
    %1 = vector.extract_strided_slice %0 {offsets = [0, 0], sizes = [4, 512], strides = [1, 1]} : vector<8x512xf32> to vector<4x512xf32>
    %cst = arith.constant 5.000000e-01 : f32
    %2 = vector.broadcast %cst : f32 to vector<4x512xf32>
    %3 = arith.mulf %2, %1 : vector<4x512xf32>
    %4 = vector.extract_strided_slice %0 {offsets = [4, 0], sizes = [4, 512], strides = [1, 1]} : vector<8x512xf32> to vector<4x512xf32>
    %cst_1 = arith.constant -5.000000e-01 : f32
    %5 = vector.broadcast %cst_1 : f32 to vector<4x512xf32>
    %6 = arith.mulf %5, %4 : vector<4x512xf32>
    %7 = tpu.iota {dimensions = array<i32: 0>} : vector<16x1xi32>
    %c0_i32 = arith.constant 0 : i32
    %8 = vector.broadcast %c0_i32 : i32 to vector<16x1xi32>
    %9 = arith.shrsi %7, %8 : vector<16x1xi32>
    %c1_i32 = arith.constant 1 : i32
    %10 = vector.broadcast %c1_i32 : i32 to vector<16x1xi32>
    %11 = arith.andi %9, %10 : vector<16x1xi32>
    %c2_i32 = arith.constant 2 : i32
    %12 = vector.broadcast %c2_i32 : i32 to vector<16x1xi32>
    %13 = arith.muli %12, %11 : vector<16x1xi32>
    %c1_i32_2 = arith.constant 1 : i32
    %14 = vector.broadcast %c1_i32_2 : i32 to vector<16x1xi32>
    %15 = arith.subi %14, %13 : vector<16x1xi32>
    %16 = arith.sitofp %15 : vector<16x1xi32> to vector<16x1xf32>
    %17 = vector.extract_strided_slice %3 {offsets = [0, 0], sizes = [1, 512], strides = [1, 1]} : vector<4x512xf32> to vector<1x512xf32>
    %18 = vector.broadcast %16 : vector<16x1xf32> to vector<16x512xf32>
    %19 = vector.broadcast %17 : vector<1x512xf32> to vector<16x512xf32>
    %20 = arith.mulf %18, %19 : vector<16x512xf32>
    %cst_3 = arith.constant 5.000000e-01 : f32
    %21 = vector.broadcast %cst_3 : f32 to vector<16x512xf32>
    %22 = arith.addf %21, %20 : vector<16x512xf32>
    %23 = vector.extract_strided_slice %6 {offsets = [0, 0], sizes = [1, 512], strides = [1, 1]} : vector<4x512xf32> to vector<1x512xf32>
    %24 = vector.shape_cast %23 : vector<1x512xf32> to vector<1x512xf32>
    %25 = vector.broadcast %24 : vector<1x512xf32> to vector<16x512xf32>
    %c1_i32_4 = arith.constant 1 : i32
    %26 = vector.broadcast %c1_i32_4 : i32 to vector<16x1xi32>
    %27 = arith.shrsi %7, %26 : vector<16x1xi32>
    %c1_i32_5 = arith.constant 1 : i32
    %28 = vector.broadcast %c1_i32_5 : i32 to vector<16x1xi32>
    %29 = arith.andi %27, %28 : vector<16x1xi32>
    %c2_i32_6 = arith.constant 2 : i32
    %30 = vector.broadcast %c2_i32_6 : i32 to vector<16x1xi32>
    %31 = arith.muli %30, %29 : vector<16x1xi32>
    %c1_i32_7 = arith.constant 1 : i32
    %32 = vector.broadcast %c1_i32_7 : i32 to vector<16x1xi32>
    %33 = arith.subi %32, %31 : vector<16x1xi32>
    %34 = arith.sitofp %33 : vector<16x1xi32> to vector<16x1xf32>
    %35 = vector.extract_strided_slice %3 {offsets = [1, 0], sizes = [1, 512], strides = [1, 1]} : vector<4x512xf32> to vector<1x512xf32>
    %36 = vector.broadcast %34 : vector<16x1xf32> to vector<16x512xf32>
    %37 = vector.broadcast %35 : vector<1x512xf32> to vector<16x512xf32>
    %38 = arith.mulf %36, %37 : vector<16x512xf32>
    %cst_8 = arith.constant 5.000000e-01 : f32
    %39 = vector.broadcast %cst_8 : f32 to vector<16x512xf32>
    %40 = arith.addf %39, %38 : vector<16x512xf32>
    %41 = vector.extract_strided_slice %6 {offsets = [1, 0], sizes = [1, 512], strides = [1, 1]} : vector<4x512xf32> to vector<1x512xf32>
    %42 = arith.mulf %22, %40 : vector<16x512xf32>
    %43 = vector.broadcast %41 : vector<1x512xf32> to vector<16x512xf32>
    %44 = arith.mulf %25, %43 : vector<16x512xf32>
    %45 = arith.subf %42, %44 : vector<16x512xf32>
    %46 = vector.broadcast %41 : vector<1x512xf32> to vector<16x512xf32>
    %47 = arith.mulf %22, %46 : vector<16x512xf32>
    %48 = arith.mulf %25, %40 : vector<16x512xf32>
    %49 = arith.addf %47, %48 : vector<16x512xf32>
    %c2_i32_9 = arith.constant 2 : i32
    %50 = vector.broadcast %c2_i32_9 : i32 to vector<16x1xi32>
    %51 = arith.shrsi %7, %50 : vector<16x1xi32>
    %c1_i32_10 = arith.constant 1 : i32
    %52 = vector.broadcast %c1_i32_10 : i32 to vector<16x1xi32>
    %53 = arith.andi %51, %52 : vector<16x1xi32>
    %c2_i32_11 = arith.constant 2 : i32
    %54 = vector.broadcast %c2_i32_11 : i32 to vector<16x1xi32>
    %55 = arith.muli %54, %53 : vector<16x1xi32>
    %c1_i32_12 = arith.constant 1 : i32
    %56 = vector.broadcast %c1_i32_12 : i32 to vector<16x1xi32>
    %57 = arith.subi %56, %55 : vector<16x1xi32>
    %58 = arith.sitofp %57 : vector<16x1xi32> to vector<16x1xf32>
    %59 = vector.extract_strided_slice %3 {offsets = [2, 0], sizes = [1, 512], strides = [1, 1]} : vector<4x512xf32> to vector<1x512xf32>
    %60 = vector.broadcast %58 : vector<16x1xf32> to vector<16x512xf32>
    %61 = vector.broadcast %59 : vector<1x512xf32> to vector<16x512xf32>
    %62 = arith.mulf %60, %61 : vector<16x512xf32>
    %cst_13 = arith.constant 5.000000e-01 : f32
    %63 = vector.broadcast %cst_13 : f32 to vector<16x512xf32>
    %64 = arith.addf %63, %62 : vector<16x512xf32>
    %65 = vector.extract_strided_slice %6 {offsets = [2, 0], sizes = [1, 512], strides = [1, 1]} : vector<4x512xf32> to vector<1x512xf32>
    %66 = arith.mulf %45, %64 : vector<16x512xf32>
    %67 = vector.broadcast %65 : vector<1x512xf32> to vector<16x512xf32>
    %68 = arith.mulf %49, %67 : vector<16x512xf32>
    %69 = arith.subf %66, %68 : vector<16x512xf32>
    %70 = vector.broadcast %65 : vector<1x512xf32> to vector<16x512xf32>
    %71 = arith.mulf %45, %70 : vector<16x512xf32>
    %72 = arith.mulf %49, %64 : vector<16x512xf32>
    %73 = arith.addf %71, %72 : vector<16x512xf32>
    %c3_i32 = arith.constant 3 : i32
    %74 = vector.broadcast %c3_i32 : i32 to vector<16x1xi32>
    %75 = arith.shrsi %7, %74 : vector<16x1xi32>
    %c1_i32_14 = arith.constant 1 : i32
    %76 = vector.broadcast %c1_i32_14 : i32 to vector<16x1xi32>
    %77 = arith.andi %75, %76 : vector<16x1xi32>
    %c2_i32_15 = arith.constant 2 : i32
    %78 = vector.broadcast %c2_i32_15 : i32 to vector<16x1xi32>
    %79 = arith.muli %78, %77 : vector<16x1xi32>
    %c1_i32_16 = arith.constant 1 : i32
    %80 = vector.broadcast %c1_i32_16 : i32 to vector<16x1xi32>
    %81 = arith.subi %80, %79 : vector<16x1xi32>
    %82 = arith.sitofp %81 : vector<16x1xi32> to vector<16x1xf32>
    %83 = vector.extract_strided_slice %3 {offsets = [3, 0], sizes = [1, 512], strides = [1, 1]} : vector<4x512xf32> to vector<1x512xf32>
    %84 = vector.broadcast %82 : vector<16x1xf32> to vector<16x512xf32>
    %85 = vector.broadcast %83 : vector<1x512xf32> to vector<16x512xf32>
    %86 = arith.mulf %84, %85 : vector<16x512xf32>
    %cst_17 = arith.constant 5.000000e-01 : f32
    %87 = vector.broadcast %cst_17 : f32 to vector<16x512xf32>
    %88 = arith.addf %87, %86 : vector<16x512xf32>
    %89 = vector.extract_strided_slice %6 {offsets = [3, 0], sizes = [1, 512], strides = [1, 1]} : vector<4x512xf32> to vector<1x512xf32>
    %90 = arith.mulf %69, %88 : vector<16x512xf32>
    %91 = vector.broadcast %89 : vector<1x512xf32> to vector<16x512xf32>
    %92 = arith.mulf %73, %91 : vector<16x512xf32>
    %93 = arith.subf %90, %92 : vector<16x512xf32>
    %94 = vector.broadcast %89 : vector<1x512xf32> to vector<16x512xf32>
    %95 = arith.mulf %69, %94 : vector<16x512xf32>
    %96 = arith.mulf %73, %88 : vector<16x512xf32>
    %97 = arith.addf %95, %96 : vector<16x512xf32>
    %c0_18 = arith.constant 0 : index
    %c0_19 = arith.constant 0 : index
    %98 = vector.load %arg4[%c0_18, %c0_19] : memref<32x512xf32, #tpu.memory_space<vmem>>, vector<16x512xf32>
    tpu.vector_store %arg4[%c0_18, %c0_19], %93 {strides = array<i32>} : memref<32x512xf32, #tpu.memory_space<vmem>>, vector<16x512xf32>,
    %c16 = arith.constant 16 : index
    %c0_20 = arith.constant 0 : index
    %99 = vector.load %arg4[%c16, %c0_20] : memref<32x512xf32, #tpu.memory_space<vmem>>, vector<16x512xf32>
    tpu.vector_store %arg4[%c16, %c0_20], %97 {strides = array<i32>} : memref<32x512xf32, #tpu.memory_space<vmem>>, vector<16x512xf32>,
    %c0_21 = arith.constant 0 : index
    %c0_22 = arith.constant 0 : index
    %100 = vector.load %arg2[%c0_21, %c0_22] : memref<32x32xf32, #tpu.memory_space<vmem>>, vector<32x32xf32>
    %c0_23 = arith.constant 0 : index
    %c0_24 = arith.constant 0 : index
    %101 = vector.load %arg4[%c0_23, %c0_24] : memref<32x512xf32, #tpu.memory_space<vmem>>, vector<32x512xf32>
    %cst_25 = arith.constant dense<0.000000e+00> : vector<32x512xf32>
    %102 = tpu.matmul %100, %101, %cst_25 {dimension_numbers = #tpu.dot_dimension_numbers<[1], [0], [0], [1], [0, 0, 1, 1], [], []>} : vector<32x32xf32>, vector<32x512xf32>, vector<32x512xf32> -> vector<32x512xf32>
    %103 = arith.mulf %102, %102 : vector<32x512xf32>
    %104 = tpu.iota {dimensions = array<i32: 1>} : vector<8x32xi32>
    %c15_i32 = arith.constant 15 : i32
    %105 = vector.broadcast %c15_i32 : i32 to vector<8x32xi32>
    %106 = arith.andi %104, %105 : vector<8x32xi32>
    %107 = tpu.iota {dimensions = array<i32: 0>} : vector<8x32xi32>
    %c3_i32_26 = arith.constant 3 : i32
    %108 = vector.broadcast %c3_i32_26 : i32 to vector<8x32xi32>
    %109 = arith.shrsi %106, %108 : vector<8x32xi32>
    %c2_i32_27 = arith.constant 2 : i32
    %110 = vector.broadcast %c2_i32_27 : i32 to vector<8x32xi32>
    %111 = arith.shrsi %106, %110 : vector<8x32xi32>
    %112 = arith.xori %109, %111 : vector<8x32xi32>
    %c1_i32_28 = arith.constant 1 : i32
    %113 = vector.broadcast %c1_i32_28 : i32 to vector<8x32xi32>
    %114 = arith.andi %112, %113 : vector<8x32xi32>
    %c1_i32_29 = arith.constant 1 : i32
    %115 = vector.broadcast %c1_i32_29 : i32 to vector<8x32xi32>
    %116 = arith.shrsi %106, %115 : vector<8x32xi32>
    %117 = arith.xori %116, %106 : vector<8x32xi32>
    %c1_i32_30 = arith.constant 1 : i32
    %118 = vector.broadcast %c1_i32_30 : i32 to vector<8x32xi32>
    %119 = arith.andi %117, %118 : vector<8x32xi32>
    %c0_i32_31 = arith.constant 0 : i32
    %120 = vector.broadcast %c0_i32_31 : i32 to vector<8x32xi32>
    %121 = arith.cmpi eq, %107, %120 : vector<8x32xi32>
    %122 = arith.select %121, %114, %119 : vector<8x32xi1>, vector<8x32xi32>
    %c2_i32_32 = arith.constant 2 : i32
    %123 = vector.broadcast %c2_i32_32 : i32 to vector<8x32xi32>
    %124 = arith.muli %123, %122 : vector<8x32xi32>
    %c1_i32_33 = arith.constant 1 : i32
    %125 = vector.broadcast %c1_i32_33 : i32 to vector<8x32xi32>
    %126 = arith.subi %125, %124 : vector<8x32xi32>
    %127 = arith.sitofp %126 : vector<8x32xi32> to vector<8x32xf32>
    %cst_34 = arith.constant dense<0.000000e+00> : vector<8x512xf32>
    %128 = tpu.matmul %127, %103, %cst_34 {dimension_numbers = #tpu.dot_dimension_numbers<[1], [0], [0], [1], [0, 0, 1, 1], [], []>} : vector<8x32xf32>, vector<32x512xf32>, vector<8x512xf32> -> vector<8x512xf32>
    %129 = vector.extract_strided_slice %128 {offsets = [0, 0], sizes = [2, 512], strides = [1, 1]} : vector<8x512xf32> to vector<2x512xf32>
    %c0_35 = arith.constant 0 : index
    %c0_36 = arith.constant 0 : index
    %130 = vector.load %arg3[%c0_35, %c0_36] : memref<2x512xf32, #tpu.memory_space<vmem>>, vector<2x512xf32>
    tpu.vector_store %arg3[%c0_35, %c0_36], %129 {strides = array<i32>} : memref<2x512xf32, #tpu.memory_space<vmem>>, vector<2x512xf32>,
    return
  }
  func.func @transform_0(%arg0: i32) -> (i32, i32) {
    %c0_i32 = arith.constant 0 : i32
    %c0_i32_0 = arith.constant 0 : i32
    return %c0_i32, %arg0 : i32, i32
  }
  func.func @transform_1(%arg0: i32) -> (i32, i32) {
    %c0_i32 = arith.constant 0 : i32
    %c0_i32_0 = arith.constant 0 : i32
    %c0_i32_1 = arith.constant 0 : i32
    return %c0_i32, %c0_i32_0 : i32, i32
  }
  func.func @transform_2(%arg0: i32) -> (i32, i32) {
    %c0_i32 = arith.constant 0 : i32
    %c0_i32_0 = arith.constant 0 : i32
    return %c0_i32, %arg0 : i32, i32
  }
}

</mosaic_0001>

<bundles_post_ra>
// kernel: _vqc_forward_impl.1
= control target key start
LH: loop header
LB: loop body
LE: loop exit
PB: predicated region body
PF: predicated region fallthrough
CT: control target
= control target key end

     0   :  { %v1301_v1 = vlaneseq  ;;  %v1302_v6 = vmov 0.0   ;;  %s1298_s0 = inlined_call_operand.vmem [shape: f32[8,512], index: 0, kind: input, shape index: {}]   ;;  %s1299_s1 = inlined_call_operand.vmem [shape: f32[32,32], index: 1, kind: input, shape index: {}]   ;;  %s1300_s2 = inlined_call_operand.hbm [shape: f32[2,512], index: 2, kind: output, shape index: {}]  }
   0x1   :  { %v13_v0 = vld [vmem:[%s1298_s0 + $0x8] sm:$0xff]  ;;  %v15_v2 = vld [vmem:[%s1298_s0 + $0x18] sm:$0xff]  ;;  %v12_v3 = vld [vmem:[%s1298_s0] sm:$0xff]  ;;  %510 = vmatprep.mubr.f32.mxu0 %v1302_v6  ;;  %599 = vmatprep.mubr.f32.mxu1 %v1302_v6 }
   0x2   :  { %v17_v4 = vmul.f32 0.5, %v13_v0  ;;  %v14_v5 = vld [vmem:[%s1298_s0 + $0x10] sm:$0xff]  ;;  %v21_v7 = vmul.f32 -0.5, %v13_v0  ;;  %v905_v8 = vshrl.u32 %v1301_v1, 7  ;;  %v19_v9 = vmul.f32 0.5, %v15_v2 }
   0x3   :  { %v23_v10 = vmul.f32 -0.5, %v15_v2  ;;  %v907_v11 = vmul.f32 0.5, %v12_v3  ;;  %v909_v12 = vmul.f32 -0.5, %v12_v3  ;;  %v911_v13 = vmul.f32 0.5, %v14_v5 }
   0x4   :  { %1311 = vst [vmem:[#allocation6_spill] sm:$0xff] %v905_v8  ;;  %v913_v14 = vmul.f32 -0.5, %v14_v5 }
   0x5   :  { %7 = vsyncpa [#allocation4], 0  ;;  %v26_v15 = vadd.s32 8, %v905_v8  ;;  %v917_v16 = vsub.s32 0, %v905_v8  ;;  %v920_v17 = vsub.s32 4, %v905_v8  ;;  %v923_v18 = vsub.s32 1, %v905_v8 }
   0x6   :  { %v926_v19 = vsub.s32 5, %v905_v8  ;;  %v929_v20 = vsub.s32 2, %v905_v8  ;;  %v932_v21 = vsub.s32 6, %v905_v8  ;;  %v935_v22 = vsub.s32 3, %v905_v8 }
   0x7   :  { %v28_v23 = vand.u32 1, %v26_v15  ;;  %v938_v24 = vrot.slane %v17_v4, %v917_v16  ;;  %v941_v25 = vrot.slane %v21_v7, %v920_v17  ;;  %v84_v26 = vshra.s32 %v26_v15, 1 }
   0x8   :  { %v944_v27 = vrot.slane %v17_v4, %v923_v18  ;;  %v947_v28 = vrot.slane %v21_v7, %v926_v19  ;;  %v186_v29 = vshra.s32 %v26_v15, 2  ;;  %v950_v30 = vrot.slane %v17_v4, %v929_v20 }
   0x9   :  { %v30_v31 = vmul.u32 2, %v28_v23  ;;  %v86_v32 = vand.u32 1, %v84_v26  ;;  %v953_v33 = vrot.slane %v21_v7, %v932_v21  ;;  %v292_v34 = vshra.s32 %v26_v15, 3 }
   0xa   :  { %v957_v35 = vmul.f32 %v947_v28, %v941_v25  ;;  %v188_v36 = vand.u32 1, %v186_v29  ;;  %v960_v37 = vrot.slane %v17_v4, %v935_v22  ;;  %v963_v38 = vsub.s32 7, %v905_v8 }
   0xb   :  { %v32_v39 = vsub.s32 1, %v30_v31  ;;  %v88_v40 = vmul.u32 2, %v86_v32  ;;  %v294_v41 = vand.u32 1, %v292_v34  ;;  %v966_v42 = vrot.slane %v19_v9, %v917_v16 }
   0xc   :  { %v190_v43 = vmul.u32 2, %v188_v36  ;;  %v969_v44 = vrot.slane %v21_v7, %v963_v38  ;;  %v972_v45 = vrot.slane %v23_v10, %v920_v17  ;;  %v975_v46 = vrot.slane %v19_v9, %v923_v18 }
   0xd   :  { %v977_v47 = vcvt.s32.f32 %v32_v39  ;;  %v90_v48 = vsub.s32 1, %v88_v40  ;;  %v296_v49 = vmul.u32 2, %v294_v41  ;;  %v980_v50 = vrot.slane %v23_v10, %v926_v19 }
   0xe   :  { %v192_v51 = vsub.s32 1, %v190_v43  ;;  %v983_v52 = vrot.slane %v19_v9, %v929_v20  ;;  %v986_v53 = vrot.slane %v23_v10, %v932_v21  ;;  %v989_v54 = vrot.slane %v19_v9, %v935_v22 }
   0xf   :  { %v56_v55 = vmul.f32 %v938_v24, %v977_v47  ;;  %v993_v56 = vcvt.s32.f32 %v90_v48  ;;  %v298_v57 = vsub.s32 1, %v296_v49  ;;  %v58_v58 = vmul.f32 %v966_v42, %v977_v47 }
  0x10   :  { %v997_v59 = vcvt.s32.f32 %v192_v51  ;;  %v1001_v60 = vmul.f32 %v980_v50, %v972_v45  ;;  %v1004_v61 = vrot.slane %v23_v10, %v963_v38  ;;  %v1008_v62 = vrot.slane %v907_v11, %v917_v16 }
  0x11   :  { %v64_v63 = vadd.f32 0.5, %v56_v55  ;;  %v114_v0 = vmul.f32 %v944_v27, %v993_v56  ;;  %v1012_v2 = vcvt.s32.f32 %v298_v57  ;;  %v66_v3 = vadd.f32 0.5, %v58_v58 }
  0x12   :  { %v216_v4 = vmul.f32 %v950_v30, %v997_v59  ;;  %v116_v5 = vmul.f32 %v975_v46, %v993_v56  ;;  %v218_v7 = vmul.f32 %v983_v52, %v997_v59  ;;  %v55_v9 = vmul.f32 %v1008_v62, %v977_v47 }
  0x13   :  { %v122_v10 = vadd.f32 0.5, %v114_v0  ;;  %v166_v15 = vmul.f32 %v947_v28, %v64_v63  ;;  %v322_v23 = vmul.f32 %v960_v37, %v1012_v2  ;;  %v168_v26 = vmul.f32 %v980_v50, %v66_v3 }
  0x14   :  { %v224_v29 = vadd.f32 0.5, %v216_v4  ;;  %v124_v31 = vadd.f32 0.5, %v116_v5  ;;  %v226_v32 = vadd.f32 0.5, %v218_v7  ;;  %v324_v34 = vmul.f32 %v989_v54, %v1012_v2 }
  0x15   :  { %v130_v36 = vmul.f32 %v122_v10, %v64_v63  ;;  %v174_v39 = vmul.f32 %v122_v10, %v941_v25  ;;  %v1029_v40 = vadd.f32 0.5, %v322_v23  ;;  %v63_v41 = vadd.f32 0.5, %v55_v9 }
  0x16   :  { %v132_v43 = vmul.f32 %v124_v31, %v66_v3  ;;  %v176_v48 = vmul.f32 %v124_v31, %v972_v45  ;;  %v1032_v49 = vadd.f32 0.5, %v324_v34  ;;  %v1036_v51 = vrot.slane %v909_v12, %v920_v17 }
  0x17   :  { %v158_v55 = vsub.f32 %v130_v36, %v957_v35  ;;  %v182_v57 = vadd.f32 %v174_v39, %v166_v15  ;;  %v1041_v58 = vrot.slane %v907_v11, %v923_v18  ;;  %v1045_v63 = vrot.slane %v909_v12, %v926_v19 }
  0x18   :  { %1312 = vst [vmem:[#allocation7_spill] sm:$0xff] %v1032_v49  ;;  %v160_v0 = vsub.f32 %v132_v43, %v1001_v60  ;;  %v184_v3 = vadd.f32 %v176_v48, %v168_v26  ;;  %v1050_v4 = vrot.slane %v907_v11, %v929_v20  ;;  %v1054_v5 = vrot.slane %v909_v12, %v932_v21 }
  0x19   :  { %v232_v7 = vmul.f32 %v224_v29, %v158_v55  ;;  %v256_v9 = vmul.f32 %v953_v33, %v182_v57  ;;  %v272_v10 = vmul.f32 %v953_v33, %v158_v55  ;;  %v280_v15 = vmul.f32 %v224_v29, %v182_v57 }
  0x1a   :  { %v234_v23 = vmul.f32 %v226_v32, %v160_v0  ;;  %v258_v31 = vmul.f32 %v986_v53, %v184_v3  ;;  %v274_v34 = vmul.f32 %v986_v53, %v160_v0  ;;  %v282_v26 = vmul.f32 %v226_v32, %v184_v3 }
  0x1b   :  { %v1060_v36 = vsub.f32 %v232_v7, %v256_v9  ;;  %v1062_v39 = vadd.f32 %v280_v15, %v272_v10  ;;  %v113_v43 = vmul.f32 %v1041_v58, %v993_v56  ;;  %v1068_v48 = vmul.f32 %v1045_v63, %v1036_v51 }
  0x1c   :  { %v1070_v1 = vsub.f32 %v234_v23, %v258_v31  ;;  %v1072_v29 = vadd.f32 %v282_v26, %v274_v34  ;;  %v165_v55 = vmul.f32 %v1045_v63, %v63_v41  ;;  %v215_v32 = vmul.f32 %v1050_v4, %v997_v59 }
  0x1d   :  { %v378_v57 = vmul.f32 %v969_v44, %v1060_v36  ;;  %v386_v0 = vmul.f32 %v1029_v40, %v1062_v39  ;;  %v121_v3 = vadd.f32 0.5, %v113_v43  ;;  %v1083_v7 = vrot.slane %v907_v11, %v935_v22 }
  0x1e   :  { %1313 = vst [vmem:[#allocation8_spill] sm:$0xff] %v1072_v29  ;;  %v380_v9 = vmul.f32 %v1004_v61, %v1070_v1  ;;  %v388_v10 = vmul.f32 %v1032_v49, %v1072_v29  ;;  %v223_v15 = vadd.f32 0.5, %v215_v32  ;;  %v1091_v23 = vrot.slane %v909_v12, %v963_v38 }
  0x1f   :  { %v394_v31 = vadd.f32 %v386_v0, %v378_v57  ;;  %v129_v34 = vmul.f32 %v121_v3, %v63_v41  ;;  %v173_v26 = vmul.f32 %v121_v3, %v1036_v51  ;;  %v321_v43 = vmul.f32 %v1083_v7, %v1012_v2 }
  0x20   :  { %v396_v11 = vadd.f32 %v388_v10, %v380_v9  ;;  %v1098_v6 = vrot.slane %v911_v13, %v917_v16  ;;  %v1102_v29 = vrot.slane %v913_v14, %v920_v17  ;;  %v1106_v12 = vrot.slane %v911_v13, %v923_v18 }
  0x21   :  { %470 = vmatprep.subr.mxu0 %v394_v31  ;;  %v157_v41 = vsub.f32 %v129_v34, %v1068_v48  ;;  %v181_v32 = vadd.f32 %v173_v26, %v165_v55  ;;  %v1109_v57 = vadd.f32 0.5, %v321_v43  ;;  %v1113_v0 = vrot.slane %v913_v14, %v926_v19 }
  0x22   :  { %559 = vmatprep.subr.mxu1 %v396_v11  ;;  %v57_v16 = vmul.f32 %v1098_v6, %v977_v47  ;;  %v115_v17 = vmul.f32 %v1106_v12, %v993_v56  ;;  %v1121_v18 = vrot.slane %v911_v13, %v929_v20  ;;  %v1125_v55 = vrot.slane %v913_v14, %v932_v21 }
  0x23   :  { %1314 = vst [vmem:[#allocation9_spill] sm:$0xff] %v1109_v57  ;;  %v231_v3 = vmul.f32 %v223_v15, %v157_v41  ;;  %v255_v9 = vmul.f32 %v1054_v5, %v181_v32  ;;  %v271_v19 = vmul.f32 %v1054_v5, %v157_v41  ;;  %v279_v10 = vmul.f32 %v223_v15, %v181_v32 }
  0x24   :  { %v65_v31 = vadd.f32 0.5, %v57_v16  ;;  %v123_v34 = vadd.f32 0.5, %v115_v17  ;;  %v1131_v47 = vmul.f32 %v1113_v0, %v1102_v29  ;;  %v217_v20 = vmul.f32 %v1121_v18, %v997_v59 }
  0x25   :  { %v1135_v56 = vsub.f32 %v231_v3, %v255_v9  ;;  %v1137_v26 = vadd.f32 %v279_v10, %v271_v19  ;;  %v1141_v21 = vrot.slane %v911_v13, %v935_v22  ;;  %v1145_v15 = vrot.slane %v913_v14, %v963_v38 }
  0x26   :  { %v131_v43 = vmul.f32 %v123_v34, %v65_v31  ;;  %v167_v11 = vmul.f32 %v1113_v0, %v65_v31  ;;  %v175_v41 = vmul.f32 %v123_v34, %v1102_v29  ;;  %v225_v32 = vadd.f32 0.5, %v217_v20 }
  0x27   :  { %1315 = vst [vmem:[#allocation10_spill] sm:$0xff] %v1135_v56  ;;  %1316 = vst [vmem:[#allocation11_spill] sm:$0xff] %v1137_v26  ;;  %v377_v59 = vmul.f32 %v1091_v23, %v1135_v56  ;;  %v385_v16 = vmul.f32 %v1109_v57, %v1137_v26  ;;  %v323_v13 = vmul.f32 %v1141_v21, %v1012_v2  ;;  %v27_v22 = vand.u32 1, %v905_v8 }
  0x28   :  { %v159_v14 = vsub.f32 %v131_v43, %v1131_v47  ;;  %v183_v38 = vadd.f32 %v175_v41, %v167_v11  ;;  %v83_v17 = vshra.s32 %v905_v8, 1  ;;  %v185_v3 = vshra.s32 %v905_v8, 2 }
  0x29   :  { %v393_v9 = vadd.f32 %v385_v16, %v377_v59  ;;  %v1159_v19 = vadd.f32 0.5, %v323_v13  ;;  %v29_v10 = vmul.u32 2, %v27_v22  ;;  %v291_v31 = vshra.s32 %v905_v8, 3 }
  0x2a   :  { %v233_v34 = vmul.f32 %v225_v32, %v159_v14  ;;  %v257_v20 = vmul.f32 %v1125_v55, %v183_v38  ;;  %v273_v2 = vmul.f32 %v1125_v55, %v159_v14  ;;  %v281_v26 = vmul.f32 %v225_v32, %v183_v38 }
  0x2b   :  { %471 = vmatpush1.msra.mxu0 %v393_v9  ;;  %v31_v57 = vsub.s32 1, %v29_v10  ;;  %v85_v43 = vand.u32 1, %v83_v17  ;;  %v187_v11 = vand.u32 1, %v185_v3  ;;  %v293_v41 = vand.u32 1, %v291_v31 }
  0x2c   :  { %v1164_v56 = vsub.f32 %v233_v34, %v257_v20  ;;  %v1166_v49 = vadd.f32 %v281_v26, %v273_v2  ;;  %v1174_v32 = vmul.f32 %v1029_v40, %v1060_v36  ;;  %vm433_vm0 = vcmask 261120  }
  0x2d   :  { %v33_v59 = vcvt.s32.f32 %v31_v57  ;;  %v87_v16 = vmul.u32 2, %v85_v43  ;;  %v189_v13 = vmul.u32 2, %v187_v11  ;;  %v1186_v11 = vmul.f32 %v969_v44, %v1062_v39 }
  0x2e   :  { %v379_v22 = vmul.f32 %v1145_v15, %v1164_v56  ;;  %v387_v8 = vmul.f32 %v1159_v19, %v1166_v49  ;;  %v295_v14 = vmul.u32 2, %v293_v41 }
  0x2f   :  { %v52_v38 = vmul.f32 %v938_v24, %v33_v59  ;;  %v89_v17 = vsub.s32 1, %v87_v16  ;;  %v191_v3 = vsub.s32 1, %v189_v13  ;;  %v54_v26 = vmul.f32 %v966_v42, %v33_v59 }
  0x30   :  { %v395_v57 = vadd.f32 %v387_v8, %v379_v22  ;;  %v297_v9 = vsub.s32 1, %v295_v14  ;;  %v51_v10 = vmul.f32 %v1008_v62, %v33_v59  ;;  %v53_v31 = vmul.f32 %v1098_v6, %v33_v59 }
  0x31   :  { %v60_v34 = vadd.f32 0.5, %v52_v38  ;;  %v91_v20 = vcvt.s32.f32 %v89_v17  ;;  %v1180_v2 = vcvt.s32.f32 %v191_v3  ;;  %v62_v43 = vadd.f32 0.5, %v54_v26 }
  0x32   :  { %560 = vmatpush1.msra.mxu1 %v395_v57  ;;  %v1182_v40 = vcvt.s32.f32 %v297_v9  ;;  %v59_v36 = vadd.f32 0.5, %v51_v10  ;;  %v61_v24 = vadd.f32 0.5, %v53_v31 }
  0x33   :  { %v110_v8 = vmul.f32 %v944_v27, %v91_v20  ;;  %v162_v42 = vmul.f32 %v947_v28, %v60_v34  ;;  %v212_v6 = vmul.f32 %v950_v30, %v1180_v2  ;;  %v112_v62 = vmul.f32 %v975_v46, %v91_v20 }
  0x34   :  { %v318_v41 = vmul.f32 %v960_v37, %v1182_v40  ;;  %v164_v59 = vmul.f32 %v980_v50, %v62_v43  ;;  %v214_v16 = vmul.f32 %v983_v52, %v1180_v2  ;;  %v320_v39 = vmul.f32 %v989_v54, %v1182_v40 }
  0x35   :  { %v118_v13 = vadd.f32 0.5, %v110_v8  ;;  %v220_v27 = vadd.f32 0.5, %v212_v6  ;;  %v120_v22 = vadd.f32 0.5, %v112_v62  ;;  %v109_v28 = vmul.f32 %v1041_v58, %v91_v20 }
  0x36   :  { %v1201_v14 = vadd.f32 0.5, %v318_v41  ;;  %v222_v30 = vadd.f32 0.5, %v214_v16  ;;  %v1203_v46 = vadd.f32 0.5, %v320_v39  ;;  %v161_v37 = vmul.f32 %v1045_v63, %v59_v36 }
  0x37   :  { %v126_v38 = vmul.f32 %v118_v13, %v60_v34  ;;  %v170_v50 = vmul.f32 %v118_v13, %v941_v25  ;;  %v128_v17 = vmul.f32 %v120_v22, %v62_v43  ;;  %v172_v52 = vmul.f32 %v120_v22, %v972_v45 }
  0x38   :  { %v117_v3 = vadd.f32 0.5, %v109_v28  ;;  %v211_v54 = vmul.f32 %v1050_v4, %v1180_v2  ;;  %v317_v58 = vmul.f32 %v1083_v7, %v1182_v40  ;;  %v111_v26 = vmul.f32 %v1106_v12, %v91_v20 }
  0x39   :  { %v154_v57 = vsub.f32 %v126_v38, %v957_v35  ;;  %v178_v9 = vadd.f32 %v170_v50, %v162_v42  ;;  %v156_v63 = vsub.f32 %v128_v17, %v1001_v60  ;;  %v180_v10 = vadd.f32 %v172_v52, %v164_v59 }
  0x3a   :  { %v125_v31 = vmul.f32 %v117_v3, %v59_v36  ;;  %v169_v25 = vmul.f32 %v117_v3, %v1036_v51  ;;  %v219_v34 = vadd.f32 0.5, %v211_v54  ;;  %v1216_v45 = vadd.f32 0.5, %v317_v58 }
  0x3b   :  { %v228_v43 = vmul.f32 %v220_v27, %v154_v57  ;;  %v252_v4 = vmul.f32 %v953_v33, %v178_v9  ;;  %v268_v8 = vmul.f32 %v953_v33, %v154_v57  ;;  %v276_v7 = vmul.f32 %v220_v27, %v178_v9 }
  0x3c   :  { %v230_v6 = vmul.f32 %v222_v30, %v156_v63  ;;  %v254_v12 = vmul.f32 %v986_v53, %v180_v10  ;;  %v270_v35 = vmul.f32 %v986_v53, %v156_v63  ;;  %v278_v20 = vmul.f32 %v222_v30, %v180_v10  ;;  %v1320_v10 = vld [vmem:[#allocation8_spill] sm:$0xff] }
  0x3d   :  { %v260_v60 = vsub.f32 %v228_v43, %v252_v4  ;;  %v284_v42 = vadd.f32 %v276_v7, %v268_v8  ;;  %v153_v36 = vsub.f32 %v125_v31, %v1068_v48  ;;  %v177_v51 = vadd.f32 %v169_v25, %v161_v37  ;;  %v1321_v31 = vld [vmem:[#allocation11_spill] sm:$0xff] }
  0x3e   :  { %v262_v62 = vsub.f32 %v230_v6, %v254_v12  ;;  %v286_v41 = vadd.f32 %v278_v20, %v270_v35  ;;  %v119_v59 = vadd.f32 0.5, %v111_v26  ;;  %v163_v16 = vmul.f32 %v1113_v0, %v61_v24  ;;  %v1317_v26 = vld [vmem:[#allocation7_spill] sm:$0xff] }
  0x3f   :  { %v374_v39 = vmul.f32 %v969_v44, %v260_v60  ;;  %v382_v33 = vmul.f32 %v1201_v14, %v284_v42  ;;  %v227_v13 = vmul.f32 %v219_v34, %v153_v36  ;;  %v251_v27 = vmul.f32 %v1054_v5, %v177_v51 }
  0x40   :  { %v376_v53 = vmul.f32 %v1004_v61, %v262_v62  ;;  %v384_v22 = vmul.f32 %v1203_v46, %v286_v41  ;;  %v267_v28 = vmul.f32 %v1054_v5, %v153_v36  ;;  %v275_v48 = vmul.f32 %v219_v34, %v177_v51 }
  0x41   :  { %v390_v30 = vadd.f32 %v382_v33, %v374_v39  ;;  %v259_v37 = vsub.f32 %v227_v13, %v251_v27  ;;  %v127_v38 = vmul.f32 %v119_v59, %v61_v24  ;;  %v171_v50 = vmul.f32 %v119_v59, %v1102_v29  ;;  %v415_v59 = vld [vmem:[%s1299_s1 + $0x10] sm:$0xff] }
  0x42   :  { %v392_v0 = vadd.f32 %v384_v22, %v376_v53  ;;  %v283_v17 = vadd.f32 %v275_v48, %v267_v28  ;;  %v213_v52 = vmul.f32 %v1121_v18, %v1180_v2  ;;  %v319_v3 = vmul.f32 %v1141_v21, %v1182_v40  ;;  %v1318_v18 = vld [vmem:[#allocation10_spill] sm:$0xff]  ;;  %v1319_v2 = vld [vmem:[#allocation9_spill] sm:$0xff] }
  0x43   :  { %472 = vmatprep.subr.mxu0 %v390_v30  ;;  %v373_v54 = vmul.f32 %v1091_v23, %v259_v37  ;;  %v155_v58 = vsub.f32 %v127_v38, %v1131_v47  ;;  %v179_v5 = vadd.f32 %v171_v50, %v163_v16  ;;  %v340_v57 = vmul.f32 %v1317_v26, %v1070_v1  ;;  %v416_v16 = vld [vmem:[%s1299_s1 + $0x18] sm:$0xff] }
  0x44   :  { %561 = vmatprep.subr.mxu1 %v392_v0  ;;  %v381_v29 = vmul.f32 %v1216_v45, %v283_v17  ;;  %v221_v24 = vadd.f32 0.5, %v213_v52  ;;  %v370_v9 = vsub.f32 %v1174_v32, %v1186_v11  ;;  %v337_v63 = vmul.f32 %v1319_v2, %v1318_v18 }
  0x45   :  { %v253_v21 = vmul.f32 %v1125_v55, %v179_v5  ;;  %v269_v40 = vmul.f32 %v1125_v55, %v155_v58  ;;  %v364_v47 = vmul.f32 %v1004_v61, %v1320_v10  ;;  %v361_v1 = vmul.f32 %v1091_v23, %v1321_v31 }
  0x46   :  { %v389_v25 = vadd.f32 %v381_v29, %v373_v54  ;;  %v229_v34 = vmul.f32 %v221_v24, %v155_v58  ;;  %v277_v43 = vmul.f32 %v221_v24, %v179_v5  ;;  %v327_v4 = vadd.f32 0.5, %v319_v3  ;;  %v1324_v54 = vld [vmem:[#allocation6_spill] sm:$0xff] }
  0x47   :  { %v369_v8 = vsub.f32 %v337_v63, %v361_v1  ;;  %v339_v32 = vmul.f32 %v1159_v19, %v1164_v56  ;;  %v334_v11 = vmul.f32 %v1201_v14, %v260_v60  ;;  %v358_v7 = vmul.f32 %v969_v44, %v284_v42 }
  0x48   :  { %473 = vmatpush1.msra.mxu0 %v389_v25  ;;  %v261_v55 = vsub.f32 %v229_v34, %v253_v21  ;;  %v285_v6 = vadd.f32 %v277_v43, %v269_v40  ;;  %v363_v12 = vmul.f32 %v1145_v15, %v1166_v49  ;;  %v336_v35 = vmul.f32 %v1203_v46, %v262_v62  ;;  %v413_v46 = vld [vmem:[%s1299_s1] sm:$0xff] }
  0x49   :  { %474 = vmatprep.subr.mxu0 %v370_v9  ;;  %v366_v20 = vsub.f32 %v334_v11, %v358_v7  ;;  %v360_v36 = vmul.f32 %v1004_v61, %v286_v41  ;;  %v333_v51 = vmul.f32 %v1216_v45, %v259_v37  ;;  %v357_v56 = vmul.f32 %v1091_v23, %v283_v17 }
  0x4a   :  { %v375_v19 = vmul.f32 %v1145_v15, %v261_v55  ;;  %v383_v14 = vmul.f32 %v327_v4, %v285_v6  ;;  %475 = vmatpush1.msra.mxu0 %v369_v8  ;;  %v335_v44 = vmul.f32 %v327_v4, %v261_v55  ;;  %v372_v60 = vsub.f32 %v340_v57, %v364_v47 }
  0x4b   :  { %476 = vmatprep.subr.mxu0 %v366_v20  ;;  %v365_v42 = vsub.f32 %v333_v51, %v357_v56  ;;  %v359_v49 = vmul.f32 %v1145_v15, %v285_v6  ;;  %v371_v62 = vsub.f32 %v339_v32, %v363_v12  ;;  %v368_v45 = vsub.f32 %v336_v35, %v360_v36  ;;  %v414_v15 = vld [vmem:[%s1299_s1 + $0x8] sm:$0xff]  ;;  %s874_s1 = smov [#allocation3]  }
  0x4c   :  { %v391_v61 = vadd.f32 %v383_v14, %v375_v19  ;;  %v1322_v41 = vmov 0.0   ;;  %v1323_v39 = vlaneseq  ;;  %vm650_vm1 = vcmp.eq.s32.totalorder %v1324_v54, 0  ;;  %s829_s24 = sshll.u32 %s874_s1, 4  ;;  %s830_s24 = int_to_ptr.vmem [resolvable:$true] %s829_s24 }
  0x4d   :  { %477 = vmatpush1.msra.mxu0 %v365_v42  ;;  %v367_v23 = vsub.f32 %v335_v44, %v359_v49  ;;  %v873_v51 = vmov 1983009808   ;;  %s850_s25 = scalar_lea.vmem %s830_s24, 128  ;;  %p855_p1 = scmp.lt.s32.totalorder %s830_s24, %s830_s24 }
  0x4e   :  { %562 = vmatpush1.msra.mxu1 %v391_v61  ;;  %837 = vmatmul.mubr.msk.f32.vlgmr.msra.gmra.mxu0 %vm433_vm0, %v413_v46  ;;  %v641_v33 = vand.u32 127, %v1323_v39  ;;  %v807_v56 = vunpack.c.l.s4 %v873_v51  ;;  %p851_p0 = scmp.ne.s32.totalorder %s830_s24, %s850_s25  ;;  %p856_p2 = scmp.lt.s32.totalorder %s850_s25, %s850_s25 }
  0x4f   :  { %563 = vmatprep.subr.mxu1 %v372_v60  ;;  %516 = vmatprep.mubr.f32.mxu0 %v1322_v41 }
  0x50   :  { %564 = vmatpush1.msra.mxu1 %v371_v62  ;;  %v642_v13 = vand.u32 15, %v641_v33  ;;  %v808_v14 = vunpack.c.0.s8 %v807_v56  ;;  %p857_p3 = por %p856_p2, %p855_p1 }
  0x51   :  { %565 = vmatprep.subr.mxu1 %v368_v45 }
  0x52   :  { %566 = vmatpush1.msra.mxu1 %v367_v23  ;;  %838 = vmatmul.mubr.msk.f32.gmra.mxu0 %vm433_vm0, %v414_v15  ;;  %v643_v27 = vshra.s32 %v642_v13, 3  ;;  %v644_v53 = vshra.s32 %v642_v13, 2  ;;  %v647_v22 = vshra.s32 %v642_v13, 1  ;;  %v811_v42 = vsub.s32 %v808_v14, %v1324_v54  ;;  %p858_p4 = pnand %p857_p3, %p851_p0 }
  0x53   :  { %841 = vmatmul.mubr.msk.f32.vlgmr.msra.gmra.mxu1 %vm433_vm0, %v413_v46  ;;  %522 = vmatprep.mubr.f32.mxu0 %v1322_v41 }
  0x54   :  { %605 = vmatprep.mubr.f32.mxu1 %v1322_v41  ;;  %v645_v30 = vxor.u32 %v644_v53, %v643_v27  ;;  %v648_v37 = vxor.u32 %v647_v22, %v642_v13 }
  0x56   :  { %839 = vmatmul.mubr.msk.f32.gmra.mxu0 %vm433_vm0, %v415_v59  ;;  %v646_v17 = vand.u32 1, %v645_v30  ;;  %v649_v52 = vand.u32 1, %v648_v37 }
  0x57   :  { %842 = vmatmul.mubr.msk.f32.gmra.mxu1 %vm433_vm0, %v414_v15  ;;  %528 = vmatprep.mubr.f32.mxu0 %v1322_v41 }
  0x58   :  { %611 = vmatprep.mubr.f32.mxu1 %v1322_v41  ;;  %v651_v57 = vsel %vm650_vm1, %v646_v17, %v649_v52 }
  0x59   :  { %v652_v18 = vmul.u32 2, %v651_v57 }
  0x5a   :  { %840 = vmatmul.mubr.msk.f32.gmra.mxu0 %vm433_vm0, %v416_v16 }
  0x5b   :  { %843 = vmatmul.mubr.msk.f32.gmra.mxu1 %vm433_vm0, %v415_v59  ;;  %722 = vmatprep.mubr.f32.mxu0 %v1322_v41  ;;  %v653_v31 = vsub.s32 1, %v652_v18 }
  0x5c   :  { %617 = vmatprep.mubr.f32.mxu1 %v1322_v41 }
  0x5d   :  { %v654_v11 = vcvt.s32.f32 %v653_v31 }
  0x5f   :  { %844 = vmatmul.mubr.msk.f32.gmra.mxu1 %vm433_vm0, %v416_v16 }
  0x60   :  { %793 = vmatprep.mubr.f32.mxu1 %v1322_v41 }
 0x10e   :  { %v512_v28 = vpop.f32.mrf.mxu0 }
 0x10f   :  { %v624_v7 = vmul.f32 %v512_v28, %v512_v28 }
 0x110   :  { %v514_v48 = vpop.f32.mrf.mxu0 }
 0x111   :  { %v625_v8 = vmul.f32 %v514_v48, %v514_v48 }
 0x112   :  { %v518_v38 = vpop.f32.mrf.mxu0 }
 0x113   :  { %v601_v50 = vpop.f32.mrf.mxu1  ;;  %v628_v43 = vmul.f32 %v518_v38, %v518_v38 }
 0x114   :  { %v520_v0 = vpop.f32.mrf.mxu0  ;;  %v626_v36 = vmul.f32 %v601_v50, %v601_v50 }
 0x115   :  { %v603_v3 = vpop.f32.mrf.mxu1  ;;  %v629_v25 = vmul.f32 %v520_v0, %v520_v0 }
 0x116   :  { %v524_v58 = vpop.f32.mrf.mxu0  ;;  %v627_v20 = vmul.f32 %v603_v3, %v603_v3 }
 0x117   :  { %v607_v5 = vpop.f32.mrf.mxu1  ;;  %v632_v1 = vmul.f32 %v524_v58, %v524_v58 }
 0x118   :  { %v526_v26 = vpop.f32.mrf.mxu0  ;;  %v630_v35 = vmul.f32 %v607_v5, %v607_v5 }
 0x119   :  { %v609_v29 = vpop.f32.mrf.mxu1  ;;  %v633_v10 = vmul.f32 %v526_v26, %v526_v26 }
 0x11a   :  { %v530_v24 = vpop.f32.mrf.mxu0  ;;  %v631_v12 = vmul.f32 %v609_v29, %v609_v29 }
 0x11b   :  { %v613_v9 = vpop.f32.mrf.mxu1  ;;  %v636_v40 = vmul.f32 %v530_v24, %v530_v24 }
 0x11c   :  { %v532_v2 = vpop.f32.mrf.mxu0  ;;  %v634_v6 = vmul.f32 %v613_v9, %v613_v9 }
 0x11d   :  { %v615_v63 = vpop.f32.mrf.mxu1  ;;  %v637_v21 = vmul.f32 %v532_v2, %v532_v2 }
 0x11e   :  { %v635_v55 = vmul.f32 %v615_v63, %v615_v63 }
 0x11f   :  { %v619_v47 = vpop.f32.mrf.mxu1  ;;  %682 = vmatprep.subr.mxu0 %v637_v21 }
 0x120   :  { %683 = vmatpush1.msra.mxu0 %v636_v40  ;;  %v638_v32 = vmul.f32 %v619_v47, %v619_v47 }
 0x121   :  { %v621_v34 = vpop.f32.mrf.mxu1  ;;  %684 = vmatprep.subr.mxu0 %v633_v10 }
 0x122   :  { %v639_v4 = vmul.f32 %v621_v34, %v621_v34  ;;  %685 = vmatpush1.msra.mxu0 %v632_v1 }
 0x123   :  { %686 = vmatprep.subr.mxu0 %v629_v25 }
 0x124   :  { %753 = vmatprep.subr.mxu1 %v639_v4  ;;  %687 = vmatpush1.msra.mxu0 %v628_v43 }
 0x125   :  { %754 = vmatpush1.msra.mxu1 %v638_v32  ;;  %688 = vmatprep.subr.mxu0 %v625_v8 }
 0x126   :  { %755 = vmatprep.subr.mxu1 %v635_v55  ;;  %689 = vmatpush1.msra.mxu0 %v624_v7 }
 0x127   :  { %756 = vmatpush1.msra.mxu1 %v634_v6  ;;  %845 = vmatmul.mubr.msk.f32.vlgmr.msra.gmra.mxu0 %vm433_vm0, %v654_v11 }
 0x128   :  { %757 = vmatprep.subr.mxu1 %v631_v12 }
 0x129   :  { %758 = vmatpush1.msra.mxu1 %v630_v35 }
 0x12a   :  { %759 = vmatprep.subr.mxu1 %v627_v20 }
 0x12b   :  { %760 = vmatpush1.msra.mxu1 %v626_v36 }
 0x12c   :  { %846 = vmatmul.mubr.msk.f32.vlgmr.msra.gmra.mxu1 %vm433_vm0, %v654_v11 }
 0x1e7   :  { %v724_v19 = vpop.f32.mrf.mxu0 }
 0x1e9   :  { %v726_v44 = vpop.f32.mrf.mxu0 }
 0x1ea   :  { %v804_v60 = vcombine.low %v724_v19, %v726_v44 }
 0x1ec   :  { %v795_v49 = vpop.f32.mrf.mxu1  ;;  %v812_v61 = vrot.slane %v804_v60, %v811_v42 }
 0x1ee   :  { %v797_v46 = vpop.f32.mrf.mxu1 }
 0x1ef   :  { %v805_v62 = vcombine.low %v795_v49, %v797_v46 }
 0x1f1   :  { %v819_v45 = vrot.slane %v805_v62, %v811_v42 }
 0x1f3   :  { %v820_v23 = vcombine.low %v812_v61, %v819_v45 }
 0x1f5   :  { %822 = vst [vmem:[#allocation3] sm:$0xff] %v820_v23 }
 0x1f6   :  { %861 = shalt.err (!%p858_p4)
}
 0x1f7   :  { %832 = dma.vmem_to_hbm [thread:$0]  %s830_s24, 128, %s1300_s2, [#allocation4]  }
 0x1f8   :  { %870 = dma.done.wait [#allocation4], 128  }
 0x1f9   :  { %871 = vsyncadd [#allocation4], 4294967168 }
 0x1fa   :  { %836 = vsyncpa [#allocation4], 1 }

</bundles_post_ra>
